<compile_context>
chip_gen: v7x
topology: tpu7x:2x2x1
jax: 0.10.0
libtpu: 0.0.40
codegen_flags: <defaults>
</compile_context>

<pallas_src>
import jax
import jax.numpy as jnp
from jax.experimental import pallas as pl
from jax.experimental.pallas import tpu as pltpu

EPS = 1e-5  # torch.nn.functional.layer_norm default eps


def _layernorm_kernel(x_ref, gamma_ref, o_ref):
    # x_ref: (row_tile, D) block in VMEM; normalize each row over D.
    x = x_ref[...].astype(jnp.float32)
    d = x.shape[-1]
    inv_d = jnp.float32(1.0 / d)

    # Single pass over x: sum and sum-of-squares (fp32 accumulation), then
    # biased variance (torch semantics) via E[x^2] - mean^2.
    s = jnp.sum(x, axis=-1, keepdims=True)
    ss = jnp.sum(x * x, axis=-1, keepdims=True)
    mean = s * inv_d
    var = jnp.maximum(ss * inv_d - mean * mean, 0.0)
    inv = jax.lax.rsqrt(var + EPS)

    gamma = gamma_ref[...].astype(jnp.float32)  # (1, D)
    scale = inv * gamma                          # fold gamma into the scale
    o_ref[...] = ((x - mean) * scale).astype(o_ref.dtype)


def _choose_row_tile(rows: int, d: int, in_bytes: int, out_bytes: int,
                     vmem_bytes: int) -> int:
    """Largest multiple-of-8 row tile fitting ~half of VMEM, capped at 1024."""
    budget = vmem_bytes // 2                      # headroom for gamma/temps
    per_row = 2 * d * (in_bytes + out_bytes)      # 2-deep buffering of in + out
    tile = budget // max(per_row, 1)
    tile = max(8, min(1024, (tile // 8) * 8))
    # Don't exceed the (8-rounded) problem size.
    rows8 = max(8, ((rows + 7) // 8) * 8)
    tile = min(tile, rows8)
    # Keep >= 2 grid blocks when possible so v7x's two TensorCores both get
    # work (near-zero effect on single-TC v5e/v6e).
    if rows8 >= 16 and tile >= rows8:
        tile = max(8, ((rows8 // 2 + 7) // 8) * 8)
    return tile


def biasless_layer_norm(x: jax.Array, gamma: jax.Array) -> jax.Array:
    """LayerNorm over the last axis with weight=gamma and (implicit) zero bias.

    Matches F.layer_norm(x, x.shape[-1:], weight=gamma, bias=zeros), i.e. the
    BiaslessLayerNorm module's forward (beta is a constant-zero buffer and is
    folded out of the kernel).
    """
    orig_shape = x.shape
    d = orig_shape[-1]
    x2 = x.reshape(-1, d)
    rows = x2.shape[0]
    gamma2 = gamma.reshape(1, d)

    in_bytes = x2.dtype.itemsize
    out_bytes = x2.dtype.itemsize

    try:
        vmem_cap = int(pltpu.get_tpu_info().vmem_capacity_bytes)
    except Exception:
        vmem_cap = 64 * 1024 * 1024  # conservative default (v7x per-TC VMEM)

    row_tile = _choose_row_tile(rows, d, in_bytes, out_bytes, vmem_cap)
    grid = (pl.cdiv(rows, row_tile),)

    # Double-buffered in + out tiles + gamma + slack.
    needed = 2 * row_tile * d * (in_bytes + out_bytes) + 4 * d + (2 << 20)
    vmem_limit = int(min(int(vmem_cap * 0.9), max(needed, 16 << 20)))

    cost = pl.CostEstimate(
        flops=8 * rows * d,
        transcendentals=rows,
        bytes_accessed=rows * d * (in_bytes + out_bytes) + 4 * d,
    )

    out = pl.pallas_call(
        _layernorm_kernel,
        out_shape=jax.ShapeDtypeStruct((rows, d), x.dtype),
        grid_spec=pltpu.PrefetchScalarGridSpec(
            num_scalar_prefetch=0,
            grid=grid,
            in_specs=[
                pl.BlockSpec((row_tile, d), lambda i: (i, 0)),
                pl.BlockSpec((1, d), lambda i: (0, 0)),
            ],
            out_specs=pl.BlockSpec((row_tile, d), lambda i: (i, 0)),
        ),
        compiler_params=pltpu.CompilerParams(
            dimension_semantics=("parallel",),
            vmem_limit_bytes=vmem_limit,
        ),
        cost_estimate=cost,
    )(x2, gamma2)

    return out.reshape(orig_shape)


def _reference(x, gamma):
    mean = jnp.mean(x, axis=-1, keepdims=True)
    var = jnp.mean((x - mean) ** 2, axis=-1, keepdims=True)
    return (x - mean) / jnp.sqrt(var + EPS) * gamma


if __name__ == "__main__":
    key = jax.random.PRNGKey(0)
    k0, k1 = jax.random.split(key)

    # Shapes implied by the module: (batch, seq, hidden).
    batch, seq, hidden = 2, 8, 32
    x = jax.random.normal(k0, (batch, seq, hidden), dtype=jnp.float32)

    # Parameter init matching the PyTorch module: gamma = ones(hidden);
    # beta is a zero buffer and is folded out of the kernel.
    gamma = jnp.ones((hidden,), dtype=jnp.float32)

    out = biasless_layer_norm(x, gamma)
    out = jax.block_until_ready(out)
    assert jnp.allclose(out, _reference(x, gamma), atol=1e-5, rtol=1e-5), \
        "mismatch vs reference"

    # Secondary check: row count that is NOT a multiple of the row tile,
    # exercising the masked edge-block path (no padding copies in the wrapper).
    x_odd = jax.random.normal(k1, (3, 5, hidden), dtype=jnp.float32)
    out_odd = jax.block_until_ready(biasless_layer_norm(x_odd, gamma))
    assert jnp.allclose(out_odd, _reference(x_odd, gamma), atol=1e-5, rtol=1e-5), \
        "mismatch vs reference (edge block)"

    print("KERNEL_OK")
</pallas_src>

<mosaic_0001>
module attributes {stable_mosaic.version = 11 : i64} {
  func.func @_layernorm_kernel(%arg0: i32, %arg1: memref<8x32xf32, #tpu.memory_space<vmem>>, %arg2: memref<1x32xf32, #tpu.memory_space<vmem>>, %arg3: memref<8x32xf32, #tpu.memory_space<vmem>>) attributes {dimension_semantics = [#tpu.dimension_semantics<parallel>], iteration_bounds = array<i64: 2>, scalar_prefetch = 0 : i64, scratch_operands = 0 : i64, tpu.core_type = #tpu.core_type<tc>, window_params = [{transform_indices = @transform_0, window_bounds = array<i64: 8, 32>}, {pipeline_mode = #tpu.pipeline_mode<synchronous>, transform_indices = @transform_1, window_bounds = array<i64: 1, 32>}, {transform_indices = @transform_2, window_bounds = array<i64: 8, 32>}]} {
    %c0 = arith.constant 0 : index
    %c0_0 = arith.constant 0 : index
    %0 = vector.load %arg1[%c0, %c0_0] : memref<8x32xf32, #tpu.memory_space<vmem>>, vector<8x32xf32>
    %cst = arith.constant dense<0.000000e+00> : vector<8xf32>
    %1 = vector.multi_reduction <add>, %0, %cst [1] : vector<8x32xf32> to vector<8xf32>
    %2 = vector.shape_cast %1 : vector<8xf32> to vector<8x1xf32>
    %3 = arith.mulf %0, %0 : vector<8x32xf32>
    %cst_1 = arith.constant dense<0.000000e+00> : vector<8xf32>
    %4 = vector.multi_reduction <add>, %3, %cst_1 [1] : vector<8x32xf32> to vector<8xf32>
    %5 = vector.shape_cast %4 : vector<8xf32> to vector<8x1xf32>
    %cst_2 = arith.constant 3.125000e-02 : f32
    %6 = vector.broadcast %cst_2 : f32 to vector<8x1xf32>
    %7 = arith.mulf %2, %6 : vector<8x1xf32>
    %cst_3 = arith.constant 3.125000e-02 : f32
    %8 = vector.broadcast %cst_3 : f32 to vector<8x1xf32>
    %9 = arith.mulf %5, %8 : vector<8x1xf32>
    %10 = arith.mulf %7, %7 : vector<8x1xf32>
    %11 = arith.subf %9, %10 : vector<8x1xf32>
    %cst_4 = arith.constant 0.000000e+00 : f32
    %12 = vector.broadcast %cst_4 : f32 to vector<8x1xf32>
    %13 = arith.maximumf %11, %12 : vector<8x1xf32>
    %cst_5 = arith.constant 9.99999974E-6 : f32
    %14 = vector.broadcast %cst_5 : f32 to vector<8x1xf32>
    %15 = arith.addf %13, %14 : vector<8x1xf32>
    %16 = math.rsqrt %15 : vector<8x1xf32>
    %c0_6 = arith.constant 0 : index
    %c0_7 = arith.constant 0 : index
    %17 = vector.load %arg2[%c0_6, %c0_7] : memref<1x32xf32, #tpu.memory_space<vmem>>, vector<1x32xf32>
    %18 = vector.broadcast %16 : vector<8x1xf32> to vector<8x32xf32>
    %19 = vector.broadcast %17 : vector<1x32xf32> to vector<8x32xf32>
    %20 = arith.mulf %18, %19 : vector<8x32xf32>
    %21 = vector.broadcast %7 : vector<8x1xf32> to vector<8x32xf32>
    %22 = arith.subf %0, %21 : vector<8x32xf32>
    %23 = arith.mulf %22, %20 : vector<8x32xf32>
    %c0_8 = arith.constant 0 : index
    %c0_9 = arith.constant 0 : index
    %24 = vector.load %arg3[%c0_8, %c0_9] : memref<8x32xf32, #tpu.memory_space<vmem>>, vector<8x32xf32>
    tpu.vector_store %arg3[%c0_8, %c0_9], %23 {strides = array<i32>} : memref<8x32xf32, #tpu.memory_space<vmem>>, vector<8x32xf32>,
    return
  }
  func.func @transform_0(%arg0: i32) -> (i32, i32) {
    %c0_i32 = arith.constant 0 : i32
    %c0_i32_0 = arith.constant 0 : i32
    return %arg0, %c0_i32 : i32, i32
  }
  func.func @transform_1(%arg0: i32) -> (i32, i32) {
    %c0_i32 = arith.constant 0 : i32
    %c0_i32_0 = arith.constant 0 : i32
    %c0_i32_1 = arith.constant 0 : i32
    return %c0_i32, %c0_i32_0 : i32, i32
  }
  func.func @transform_2(%arg0: i32) -> (i32, i32) {
    %c0_i32 = arith.constant 0 : i32
    %c0_i32_0 = arith.constant 0 : i32
    return %arg0, %c0_i32 : i32, i32
  }
}

</mosaic_0001>

<bundles_post_ra>
// kernel: tpu_custom_call.1
= control target key start
LH: loop header
LB: loop body
LE: loop exit
PB: predicated region body
PF: predicated region fallthrough
CT: control target
= control target key end

     0   :  { %7 = vsyncpa [#allocation3], 0  ;;  %s613_s0 = inlined_call_operand.hbm [shape: f32[16,32], index: 0, kind: input, shape index: {}]   ;;  %s614_s1 = inlined_call_operand.vmem [shape: f32[1,32], index: 1, kind: input, shape index: {}]   ;;  %s615_s2 = inlined_call_operand.hbm [shape: f32[16,32], index: 2, kind: output, shape index: {}]  }
   0x1   :  { %9 = vsyncpa [#allocation3 + $0x1], 0 }
   0x2   :  { %10 = vsyncpa [#allocation4], 0 }
   0x3   :  { %12 = vsyncpa [#allocation4 + $0x1], 0  ;;  %s446_s9 = smov 0   ;;  %s448_s10 = smov 0  }
   0x4   :  { %s450_s11 = smov 0   ;;  %s452_s12 = smov 0  }
   0x5 LB: > { %s467_s13 = sadd.s32 4294967295, %s427_s12   ;;  %s270_s14 = sadd.s32 4294967294, %s427_s12   ;;  %s427_s12 = sphi %s452_s12, %s630_s12   ;;  %s423_s11 = sphi %s450_s11, %s629_s11   ;;  %s419_s10 = sphi %s448_s10, %s628_s10   ;;  %s415_s9 = sphi %s446_s9, %s627_s9  }
   0x6   : > { %s471_s15 = sadd.s32 1, %s427_s12   ;;  %s25_s16 = sadd.s32 1, %s423_s11 }
   0x7   : > { %s22_s17 = ssub.s32 %s427_s12, %s471_s15  ;;  %p32_p0 = scmp.ne.s32.totalorder %s423_s11, %s419_s10 }
   0x8   : > { %p23_p1 = scmp.eq.s32.totalorder %s22_s17, 0  ;;  %p33_p2 = scmp.eq.s32.totalorder %s427_s12, 0 }
   0x9   : > { %p38_p3 = scmp.ne.s32.totalorder %s419_s10, %s415_s9  ;;  %p39_p4 = scmp.eq.s32.totalorder %s467_s13, 0 }
   0xa   : > { %s483_s18 = scalar_select %p23_p1, %s423_s11, %s25_s16  }
   0xb   : > { %p485_p5 = por %p33_p2, %p32_p0  ;;  %p489_p6 = por %p39_p4, %p38_p3 }
   0xc   : > { %p83_p7 = scmp.eq.s32.totalorder %s467_s13, 1  ;;  %p89_p8 = scmp.eq.s32.totalorder %s270_s14, 1 }
   0xd   : > { %p295_p10 = scmp.lt.s32.totalorder %s427_s12, 2  ;;  %s112_s23 = sand.u32 1, %s423_s11  }
   0xe   : > { %p496_p11 = por %p83_p7, %p32_p0  ;;  %p500_p12 = por %p89_p8, %p38_p3 }
   0xf   : > { %s274_s24 = sshll.u32 %s427_s12, 7  ;;  %s273_s25 = sshll.u32 %s112_s23, 3 }
  0x10   : > { %s619_s21 = scalar_select %p496_p11, 1, 0 }
  0x11   : > { %s620_s22 = scalar_select %p500_p12, 1, 0 }
  0x12   : > { %s509_s28 = scalar_lea.hbm %s613_s0, %s274_s24  ;;  %s116_s29 = scalar_lea.vmem [#allocation2], %s273_s25 }
  0x13   : > { %s123_s30 = sshll.u32 %s116_s29, 4  ;;  %p513_p13 = pnand %p295_p10, %p485_p5  ;;  %s517_s30 = int_to_ptr.vmem [resolvable:$true] %s123_s30 }
  0x14   : > { %s113_s4 = scalar_lea.sflag [#allocation3], %s112_s23  ;;  %s331_s5 = scalar_lea.hbm %s509_s28, 128 }
  0x15   : > { %p332_p2 = scmp.ne.s32.totalorder %s509_s28, %s331_s5  ;;  %p333_p3 = pneg %p513_p13 }
  0x16   : > { %s336_s8 = scalar_lea.hbm %s613_s0, 256  ;;  %p337_p5 = scmp.lt.u32.totalorder %s509_s28, %s613_s0 }
  0x17   : > { %p334_p4 = pnand %p333_p3, %p332_p2  ;;  %p338_p8 = scmp.lt.u32.totalorder %s336_s8, %s331_s5 }
  0x18   : > { %p340_p9 = scmp.lt.u32.totalorder %s331_s5, %s509_s28 }
  0x19   : > { %p335_p7 = pneg %p334_p4  ;;  %p339_p10 = por %p338_p8, %p337_p5 }
  0x1b   : > { %p341_p0 = por %p340_p9, %p339_p10 }
  0x1d   : > { %p342_p1 = pnand %p341_p0, %p335_p7 }
  0x1f   : > { %345 = shalt.err (!%p342_p1)
}
  0x20   : > { %s346_s17 = scalar_lea.vmem %s517_s30, 128  ;;  %s429_s19 = smov [#allocation2]  }
  0x21   : > { %p347_p2 = scmp.ne.s32.totalorder %s517_s30, %s346_s17  ;;  %s351_s23 = sshll.u32 %s429_s19, 4  ;;  %s352_s23 = int_to_ptr.vmem [resolvable:$false] %s351_s23 }
  0x22   : > { %s353_s24 = scalar_lea.vmem %s352_s23, 256  ;;  %p354_p11 = scmp.lt.s32.totalorder %s517_s30, %s352_s23 }
  0x23   : > { %p349_p4 = pnand %p347_p2, %p333_p3  ;;  %p355_p5 = scmp.lt.s32.totalorder %s353_s24, %s346_s17 }
  0x25   : > { %p350_p12 = pneg %p349_p4  ;;  %p356_p8 = por %p355_p5, %p354_p11 }
  0x27   : > { %p357_p9 = pnand %p356_p8, %p350_p12 }
  0x29   : > { %360 = shalt.err (!%p357_p9)
}
  0x2a   : > { %290 = dma.hbm_to_vmem [thread:$0]  (!%p513_p13), %s509_s28, 128, %s517_s30, %s113_s4  }
  0x2b   : > { %p622_p0 = scmp.lt.s32.totalorder %s427_s12, 3  ;;  %p623_p1 = scmp.ge.s32.totalorder %s427_s12, 1 }
  0x2d   : > { %p129_p3 = pnand %p623_p1, %p622_p0 }
  0x2e   : > { %s551_s25 = sand.u32 (!%p129_p3), 1, %s419_s10  }
  0x2f   : > { %132 = sbr.rel (%p129_p3) target bundleno = 240 (0xf0), region = 28  ;;  %s276_s26 = sshll.u32 (!%p129_p3), %s551_s25, 3 }
  0x30   : > { %s135_s27 = scalar_lea.sflag (!%p129_p3), [#allocation3], %s551_s25  ;;  %s138_s29 = scalar_lea.vmem (!%p129_p3), [#allocation2], %s276_s26 }
  0x36   : > { %406 = dma.done.wait (%p489_p6), %s135_s27, 128  }
  0x37   : > { %408 = vsyncadd (%p489_p6), %s135_s27, 4294967168  ;;  %vm160_vm0 = vcmask 261120   ;;  %v159_v0 = vld [vmem:[%s138_s29] sm:$0xff]  ;;  %s280_s30 = sshll.u32 %s467_s13, 7  ;;  %s158_s3 = scalar_lea.vmem [#allocation5], %s276_s26 }
  0x38   : > { %v161_v1 = vsel %vm160_vm0, %v159_v0, 0.0  ;;  %v164_v2 = vmul.f32 %v159_v0, %v159_v0  ;;  %v278_v12 = vld [vmem:[%s614_s1] ss:$0 sm:$0xff]  ;;  %s200_s4 = sshll.u32 %s158_s3, 4  ;;  %s568_s7 = scalar_lea.hbm %s615_s2, %s280_s30  ;;  %s570_s4 = int_to_ptr.vmem [resolvable:$true] %s200_s4 }
  0x39   : > { %162 = vadd.xlane.f32.xlu0 %v161_v1  ;;  %s187_s8 = scalar_lea.sflag [#allocation4], %s551_s25  ;;  %s361_s14 = scalar_lea.vmem %s570_s4, 128 }
  0x3a   : > { %v165_v3 = vsel %vm160_vm0, %v164_v2, 0.0  ;;  %p362_p6 = scmp.ne.s32.totalorder %s570_s4, %s361_s14  ;;  %p624_p11 = scmp.ne.s32.totalorder %s619_s21, 0 }
  0x3b   : > { %s430_s13 = smov [#allocation5]  }
  0x3c   : > { %p363_p12 = pnand %p362_p6, %p624_p11  ;;  %s365_s16 = sshll.u32 %s430_s13, 4  ;;  %s366_s16 = int_to_ptr.vmem [resolvable:$false] %s365_s16 }
  0x3d   : > { %166 = vadd.xlane.f32.xlu0 %v165_v3  ;;  %s367_s17 = scalar_lea.vmem %s366_s16, 256  ;;  %p368_p7 = scmp.lt.s32.totalorder %s570_s4, %s366_s16 }
  0x3e   : > { %p364_p13 = pneg %p363_p12  ;;  %p369_p10 = scmp.lt.s32.totalorder %s367_s17, %s361_s14 }
  0x40   : > { %p370_p2 = por %p369_p10, %p368_p7 }
  0x42   : > { %p371_p4 = pnand %p370_p2, %p364_p13 }
  0xc6   : > { %v163_v4 = vpop.xlane.xlu0 %162 }
  0xc7   : > { %v168_v5 = vmul.f32 0.03125, %v163_v4 }
  0xc9   : > { %v170_v7 = vmul.f32 %v168_v5, %v168_v5  ;;  %v183_v14 = vsub.f32 %v159_v0, %v168_v5 }
  0xca   : > { %v167_v6 = vpop.xlane.xlu0 %166 }
  0xcb   : > { %v169_v8 = vmul.f32 0.03125, %v167_v6 }
  0xcd   : > { %v171_v9 = vsub.f32 %v169_v8, %v170_v7 }
  0xcf   : > { %v172_v10 = vmax.f32 %v171_v9, 0.0 }
  0xd1   : > { %v173_v11 = vadd.f32 1e-05, %v172_v10 }
  0xd3   : > { %329 = vrsqrt.f32 %v173_v11 }
  0xdd   : > { %v330_v13 = vpop.eup %329 }
  0xde   : > { %v182_v15 = vmul.f32 %v330_v13, %v278_v12 }
  0xe0   : > { %v184_v16 = vmul.f32 %v183_v14, %v182_v15 }
  0xe2   : > { %185 = vst.msk [vmem:[%s158_s3] sm:$0xff] %vm160_vm0, %v184_v16 }
  0xe3   : > { %374 = shalt.err (!%p371_p4)
}
  0xe4   : > { %s375_s19 = scalar_lea.hbm %s568_s7, 128  ;;  %s379_s25 = scalar_lea.hbm %s615_s2, 256 }
  0xe5   : > { %p376_p5 = scmp.ne.s32.totalorder %s568_s7, %s375_s19  ;;  %p380_p0 = scmp.lt.u32.totalorder %s568_s7, %s615_s2 }
  0xe6   : > { %p381_p1 = scmp.lt.u32.totalorder %s379_s25, %s375_s19  ;;  %p383_p6 = scmp.lt.u32.totalorder %s375_s19, %s568_s7 }
  0xe7   : > { %p377_p8 = pnand %p376_p5, %p624_p11 }
  0xe8   : > { %p382_p3 = por %p381_p1, %p380_p0 }
  0xe9   : > { %p378_p9 = pneg %p377_p8 }
  0xea   : > { %p384_p12 = por %p383_p6, %p382_p3 }
  0xec   : > { %p385_p13 = pnand %p384_p12, %p378_p9 }
  0xee   : > { %388 = shalt.err (!%p385_p13)
}
  0xef   : > { %285 = dma.vmem_to_hbm [thread:$0]  (%p624_p11), %s570_s4, 128, %s568_s7, %s187_s8  }
  0xf0 PF: > { %s212_s29 = sand.u32 1, %s415_s9   ;;  %p625_p7 = scmp.ne.s32.totalorder %s620_s22, 0 }
  0xf1   : > { %p626_p10 = scmp.ge.s32.totalorder %s427_s12, 2  ;;  %s213_s20 = scalar_lea.sflag [#allocation4], %s212_s29 }
  0xf3   : > { %p292_p2 = pnand %p626_p10, %p625_p7 }
  0xf5   : > { %410 = dma.done.wait (!%p292_p2), %s213_s20, 128  }
  0xf6   : > { %412 = vsyncadd (!%p292_p2), %s213_s20, 4294967168  ;;  %p15_p4 = scmp.ge.s32.totalorder %s471_s15, 4   ;;  %s627_s9 = smov %s419_s10 }
  0xf7   : > { %s628_s10 = smov %s423_s11  ;;  %s629_s11 = smov %s483_s18 }
  0xf8   : > { %s630_s12 = smov %s471_s15  ;;  %17 = sbr.rel (!%p15_p4) target bundleno = 5 (0x5), region = 73 }
  0xff   :  { %218 = vsyncpa [#allocation3], 1 }
 0x100   :  { %220 = vsyncpa [#allocation3 + $0x1], 1 }
 0x101   :  { %221 = vsyncpa [#allocation4], 1 }
 0x102   :  { %223 = vsyncpa [#allocation4 + $0x1], 1 }

</bundles_post_ra>
